<compile_context>
chip_gen: v7x
topology: tpu7x:2x2x1
jax: 0.10.0
libtpu: 0.0.40
codegen_flags: <defaults>
</compile_context>

<pallas_src>
import functools

import jax
import jax.numpy as jnp
from jax.experimental import pallas as pl
from jax.experimental.pallas import tpu as pltpu


_DEFAULT_MIN_PALLAS_ELEMS = 1 << 16        # below this, XLA's fused sin wins
_TARGET_BLOCK_BYTES = 4 * 1024 * 1024      # ~4 MiB/block; 16 MiB live (2x2)
_VMEM_LIMIT_BYTES = 48 << 20               # < 64 MiB physical per v7x TC
_SUBLANE_TILE = {4: 8, 2: 16, 1: 32}       # itemsize -> sublane tile


def _cdiv(a: int, b: int) -> int:
    return -(-a // b)


def _sine_kernel(x_ref, o_ref, *, omega):
    # omega is a compile-time Python float; the weak-typed multiply keeps
    # x.dtype.  Partial last block: OOB lanes are masked on store, so sin()
    # of whatever padding the DMA left behind is harmless (pure elementwise).
    o_ref[...] = jnp.sin(x_ref[...] * omega)


def _choose_layout(total: int, itemsize: int):
    """Pick (lane_width W, block_rows tm, num_blocks) for a flattened array.

    Caller guarantees total % 128 == 0, so the reshape to (total // W, W) is
    always free (no pad, no slice).
    """
    sub = _SUBLANE_TILE.get(itemsize, 8)

    # Lane width: largest multiple of 128 (<= 8192) dividing `total` with at
    # least 8 rows.  Any multiple of 128 is already lane-dense and each block
    # spans the full row width, so the DMA is one contiguous chunk regardless.
    W = None
    for cand in range(8192, 127, -128):
        if total % cand == 0 and total // cand >= 8:
            W = cand
            break
    if W is None:
        W = 128          # total < 1024: a few rows, single full-extent block
    M = total // W

    # Rows per block: sized for ~_TARGET_BLOCK_BYTES, multiple of the dtype's
    # sublane tile.  The last block may be partial — Pallas masks it.
    tm = _TARGET_BLOCK_BYTES // (W * itemsize)
    tm = max(sub, (tm // sub) * sub)

    if tm >= M:
        # Whole array fits in one block.  Split in two (rounded up to the
        # sublane tile, masked partial last block) whenever the row count
        # allows, so the "parallel" axis can use both v7x TensorCores.
        if M >= 2 * sub:
            tm = _cdiv(_cdiv(M, 2), sub) * sub
        else:
            tm = M       # full-extent rows (legal even below the sublane tile)

    num_blocks = _cdiv(M, tm)

    # Prefer an even block count (no idle TC at the tail on v7x) when it only
    # costs a slightly smaller block.
    if num_blocks > 1 and num_blocks % 2 == 1:
        tm_even = _cdiv(_cdiv(M, num_blocks + 1), sub) * sub
        if tm_even >= sub and _cdiv(M, tm_even) % 2 == 0:
            tm = tm_even
            num_blocks = _cdiv(M, tm)

    return W, tm, num_blocks


def sine(x: jax.Array, omega: float = 30.0,
         min_pallas_elems: int = _DEFAULT_MIN_PALLAS_ELEMS) -> jax.Array:
    """Applies y = sin(omega * x) elementwise via a Pallas TPU kernel."""
    orig_shape = x.shape
    dtype = x.dtype
    total = x.size
    omega = float(omega)

    # Tiny tensors (launch/step overhead dominates) or element counts not
    # divisible by 128 (would require pad+slice = 3x HBM traffic): let XLA's
    # fused elementwise handle them.
    if total < max(min_pallas_elems, 1) or total % 128 != 0:
        return jnp.sin(x * omega)

    itemsize = jnp.dtype(dtype).itemsize
    W, tm, num_blocks = _choose_layout(total, itemsize)
    M = total // W

    x2 = x.reshape(M, W)   # free: contiguous reshape, W divides total exactly

    out = pl.pallas_call(
        functools.partial(_sine_kernel, omega=omega),
        out_shape=jax.ShapeDtypeStruct((M, W), dtype),
        grid=(num_blocks,),
        in_specs=[pl.BlockSpec((tm, W), lambda i: (i, 0))],
        out_specs=pl.BlockSpec((tm, W), lambda i: (i, 0)),
        compiler_params=pltpu.CompilerParams(
            dimension_semantics=("parallel",),
            vmem_limit_bytes=_VMEM_LIMIT_BYTES,
        ),
        cost_estimate=pl.CostEstimate(
            flops=total,
            transcendentals=total,
            bytes_accessed=2 * total * itemsize,
        ),
    )(x2)

    return out.reshape(orig_shape)


class Sine:
    """JAX/Pallas equivalent of the PyTorch Sine module (no parameters)."""

    def __init__(self, omega: float = 30.0):
        self.omega = omega

    def __call__(self, x: jax.Array) -> jax.Array:
        return sine(x, self.omega)

    def __repr__(self):
        return f"Sine({self.omega})"


if __name__ == "__main__":
    key = jax.random.PRNGKey(0)
    k_small, k_big = jax.random.split(key)

    layer = Sine(omega=30.0)

    # 1) Small SIREN-style feature tensor (batch=2, seq=8, hidden=32).
    #    Force the Pallas path (normally the tiny-tensor fallback) to exercise
    #    the kernel + layout logic with a full-extent sub-(8,128) block.
    x_small = jax.random.normal(k_small, (2, 8, 32), dtype=jnp.float32)
    y_small = sine(x_small, 30.0, min_pallas_elems=0)
    jax.block_until_ready(y_small)
    ref_small = jnp.sin(30.0 * x_small)
    assert y_small.shape == x_small.shape and y_small.dtype == x_small.dtype
    assert jnp.allclose(y_small, ref_small, atol=1e-5, rtol=1e-5)

    # 2) Moderate tensor that takes the lane-dense tiled kernel path by
    #    default (zero-copy reshape, 2 blocks on the parallel axis).
    x_big = jax.random.normal(k_big, (2, 256, 256), dtype=jnp.float32)
    y_big = layer(x_big)
    jax.block_until_ready(y_big)
    ref_big = jnp.sin(30.0 * x_big)
    assert y_big.shape == x_big.shape and y_big.dtype == x_big.dtype
    assert jnp.allclose(y_big, ref_big, atol=1e-5, rtol=1e-5)

    # 3) Shape whose row count does not divide the block rows: exercises the
    #    masked partial last block (no pad / no slice anywhere).
    x_odd = jax.random.normal(key, (3, 40, 384), dtype=jnp.float32)
    y_odd = sine(x_odd, 30.0, min_pallas_elems=0)
    jax.block_until_ready(y_odd)
    assert jnp.allclose(y_odd, jnp.sin(30.0 * x_odd), atol=1e-5, rtol=1e-5)

    print("KERNEL_OK")
</pallas_src>

<mosaic_0001>
module attributes {stable_mosaic.version = 11 : i64} {
  func.func @_sine_kernel(%arg0: i32, %arg1: memref<4x128xf32, #tpu.memory_space<vmem>>, %arg2: memref<4x128xf32, #tpu.memory_space<vmem>>) attributes {dimension_semantics = [#tpu.dimension_semantics<parallel>], iteration_bounds = array<i64: 1>, scalar_prefetch = 0 : i64, scratch_operands = 0 : i64, tpu.core_type = #tpu.core_type<tc>, window_params = [{transform_indices = @transform_0, window_bounds = array<i64: 4, 128>}, {transform_indices = @transform_1, window_bounds = array<i64: 4, 128>}]} {
    %c0 = arith.constant 0 : index
    %c0_0 = arith.constant 0 : index
    %0 = vector.load %arg1[%c0, %c0_0] : memref<4x128xf32, #tpu.memory_space<vmem>>, vector<4x128xf32>
    %cst = arith.constant 3.000000e+01 : f32
    %1 = vector.broadcast %cst : f32 to vector<4x128xf32>
    %2 = arith.mulf %0, %1 : vector<4x128xf32>
    %3 = math.sin %2 : vector<4x128xf32>
    %c0_1 = arith.constant 0 : index
    %c0_2 = arith.constant 0 : index
    %4 = vector.load %arg2[%c0_1, %c0_2] : memref<4x128xf32, #tpu.memory_space<vmem>>, vector<4x128xf32>
    tpu.vector_store %arg2[%c0_1, %c0_2], %3 {strides = array<i32>} : memref<4x128xf32, #tpu.memory_space<vmem>>, vector<4x128xf32>,
    return
  }
  func.func @transform_0(%arg0: i32) -> (i32, i32) {
    %c0_i32 = arith.constant 0 : i32
    %c0_i32_0 = arith.constant 0 : i32
    return %arg0, %c0_i32 : i32, i32
  }
  func.func @transform_1(%arg0: i32) -> (i32, i32) {
    %c0_i32 = arith.constant 0 : i32
    %c0_i32_0 = arith.constant 0 : i32
    return %arg0, %c0_i32 : i32, i32
  }
}

</mosaic_0001>

<bundles_post_ra>
// kernel: tpu_custom_call.1
= control target key start
LH: loop header
LB: loop body
LE: loop exit
PB: predicated region body
PF: predicated region fallthrough
CT: control target
= control target key end

     0   :  { %6 = vsyncpa [#allocation3], 0  ;;  %s274_s0 = inlined_call_operand.hbm [shape: f32[4,128], index: 0, kind: input, shape index: {}]   ;;  %s275_s1 = inlined_call_operand.hbm [shape: f32[4,128], index: 1, kind: output, shape index: {}]  }
   0x1   :  { %7 = vsyncpa [#allocation4], 0  ;;  %s211_s6 = smov [#allocation2]   ;;  %s163_s10 = scalar_lea.hbm %s274_s0, 64 }
   0x2   :  { %s14_s7 = sshll.u32 %s211_s6, 4  ;;  %p164_p0 = scmp.ne.s32.totalorder %s274_s0, %s163_s10  ;;  %s15_s7 = int_to_ptr.vmem [resolvable:$true] %s14_s7 }
   0x3   :  { %p167_p1 = scmp.lt.u32.totalorder %s163_s10, %s274_s0 }
   0x5   :  { %p169_p2 = pnand %p167_p1, %p164_p0 }
   0x7   :  { %172 = shalt.err (!%p169_p2)
}
   0x8   :  { %s173_s15 = scalar_lea.vmem %s15_s7, 64  ;;  %p178_p4 = scmp.lt.s32.totalorder %s15_s7, %s15_s7 }
   0x9   :  { %p174_p3 = scmp.ne.s32.totalorder %s15_s7, %s173_s15  ;;  %p179_p5 = scmp.lt.s32.totalorder %s173_s15, %s173_s15 }
   0xb   :  { %p180_p6 = por %p179_p5, %p178_p4 }
   0xd   :  { %p181_p7 = pnand %p180_p6, %p174_p3 }
   0xf   :  { %184 = shalt.err (!%p181_p7)
}
  0x10   :  { %17 = dma.hbm_to_vmem [thread:$0]  %s274_s0, 64, %s15_s7, [#allocation3]  }
  0x11   :  { %207 = dma.done.wait [#allocation3], 64  }
  0x12   :  { %208 = vsyncadd [#allocation3], 4294967232  ;;  %v21_v0 = vld [vmem:[#allocation2] sm:$0xf]  ;;  %v212_v13 = vmov 683565275  }
  0x13   :  { %v241_v1 = vmul.f32 30.0, %v21_v0  ;;  %v213_v15 = vmov 2475754826   ;;  %v214_v17 = vmov 2131351028   ;;  %s218_s0 = smov [#allocation5]  }
  0x14   :  { %v215_v19 = vmov 2102212464   ;;  %v216_v21 = vmov 920167782   ;;  %v217_v28 = vmov 1326507024  }
  0x15   :  { %v26_v2 = vand.u32 2139095040, %v241_v1  ;;  %v23_v4 = vand.u32 2147483647, %v241_v1  ;;  %vm25_vm7 = vcmp.lt.s32.totalorder %v241_v1, 0  ;;  %s134_s18 = sshll.u32 %s218_s0, 4  ;;  %vm115_vm12 = vweird.f32 %v241_v1  ;;  %s135_s18 = int_to_ptr.vmem [resolvable:$true] %s134_s18 }
  0x16   :  { %s185_s19 = scalar_lea.vmem %s135_s18, 64  ;;  %p190_p9 = scmp.lt.s32.totalorder %s135_s18, %s135_s18 }
  0x17   :  { %v27_v3 = vshrl.u32 %v26_v2, 23  ;;  %v30_v7 = vand.u32 8388607, %v23_v4  ;;  %vm24_vm8 = vcmp.le.f32.partialorder %v23_v4, 0.7853982  ;;  %p186_p8 = scmp.ne.s32.totalorder %s135_s18, %s185_s19  ;;  %p191_p10 = scmp.lt.s32.totalorder %s185_s19, %s185_s19 }
  0x19   :  { %v143_v5 = vadd.s32 4294967169, %v27_v3  ;;  %v31_v10 = vor.u32 8388608, %v30_v7  ;;  %p192_p11 = por %p191_p10, %p190_p9 }
  0x1b   :  { %v33_v6 = vadd.s32 1, %v143_v5  ;;  %v71_v30 = vshll.u32 %v31_v10, 8  ;;  %p193_p12 = pnand %p192_p11, %p186_p8 }
  0x1d   :  { %vm34_vm0 = vcmp.gt.s32.totalorder %v33_v6, 0 }
  0x1e   :  { %v35_v8 = vsel %vm34_vm0, %v33_v6, 0 }
  0x1f   :  { %v37_v9 = vand.u32 31, %v35_v8  ;;  %v36_v11 = vshrl.u32 %v35_v8, 5 }
  0x21   :  { %v38_v12 = vsub.s32 32, %v37_v9  ;;  %v40_v14 = vshll.u32 %v212_v13, %v37_v9  ;;  %v43_v16 = vshll.u32 %v213_v15, %v37_v9  ;;  %v46_v18 = vshll.u32 %v214_v17, %v37_v9 }
  0x22   :  { %v49_v20 = vshll.u32 %v215_v19, %v37_v9  ;;  %v52_v22 = vshll.u32 %v216_v21, %v37_v9  ;;  %vm55_vm1 = vcmp.lt.s32.totalorder %v36_v11, 1  ;;  %vm58_vm2 = vcmp.lt.s32.totalorder %v36_v11, 4 }
  0x23   :  { %v39_v23 = vshrl.u32 %v212_v13, %v38_v12  ;;  %v41_v24 = vshrl.u32 %v213_v15, %v38_v12  ;;  %v44_v25 = vshrl.u32 %v214_v17, %v38_v12  ;;  %v47_v26 = vshrl.u32 %v215_v19, %v38_v12 }
  0x24   :  { %v50_v27 = vshrl.u32 %v216_v21, %v38_v12  ;;  %v53_v29 = vshrl.u32 %v217_v28, %v38_v12  ;;  %vm56_vm3 = vcmp.lt.s32.totalorder %v36_v11, 2  ;;  %vm57_vm4 = vcmp.lt.s32.totalorder %v36_v11, 3 }
  0x25   :  { %v42_v31 = vor.u32 %v41_v24, %v40_v14  ;;  %v45_v32 = vor.u32 %v44_v25, %v43_v16  ;;  %v48_v33 = vor.u32 %v47_v26, %v46_v18 }
  0x26   :  { %v51_v34 = vor.u32 %v50_v27, %v49_v20  ;;  %v54_v35 = vor.u32 %v53_v29, %v52_v22 }
  0x27   :  { %v59_v36 = vsel %vm55_vm1, %v39_v23, %v42_v31  ;;  %v60_v37 = vsel %vm58_vm2, %v48_v33, 2102212464  ;;  %v63_v38 = vsel %vm55_vm1, %v42_v31, %v45_v32  ;;  %v67_v39 = vsel %vm55_vm1, %v45_v32, %v48_v33 }
  0x28   :  { %v61_v40 = vsel %vm57_vm4, %v45_v32, %v60_v37  ;;  %v64_v41 = vsel %vm58_vm2, %v51_v34, 920167782  ;;  %v68_v42 = vsel %vm58_vm2, %v54_v35, 1326507024 }
  0x29   :  { %v65_v43 = vsel %vm57_vm4, %v48_v33, %v64_v41  ;;  %v69_v44 = vsel %vm57_vm4, %v51_v34, %v68_v42  ;;  %v62_v45 = vsel %vm56_vm3, %v59_v36, %v61_v40 }
  0x2a   :  { %v66_v46 = vsel %vm56_vm3, %v63_v38, %v65_v43  ;;  %v70_v47 = vsel %vm56_vm3, %v67_v39, %v69_v44  ;;  %v78_v52 = vmul.u32 %v71_v30, %v62_v45 }
  0x2b   :  { %v247_v48 = vmul.u32.u64.low %v71_v30, %v70_v47  ;;  %v248_v49 = vmul.u32.u64.high %v71_v30, %v70_v47, %v247_v48  ;;  %v250_v50 = vmul.u32.u64.low %v71_v30, %v66_v46  ;;  %v251_v51 = vmul.u32.u64.high %v71_v30, %v66_v46, %v250_v50 }
  0x2d   :  { %vm80_vm5 = vc.u32 %v248_v49, %v250_v50  ;;  %v81_v53 = vadd.s32 1, %v251_v51  ;;  %v79_v0 = vadd.s32 %v250_v50, %v248_v49 }
  0x2f   :  { %v82_v54 = vsel %vm80_vm5, %v81_v53, %v251_v51 }
  0x30   :  { %v83_v55 = vadd.s32 %v82_v54, %v78_v52 }
  0x32   :  { %v84_v56 = vadd.s32 536870912, %v83_v55 }
  0x34   :  { %v85_v57 = vshrl.u32 %v84_v56, 30 }
  0x36   :  { %v86_v58 = vshll.u32 %v85_v57, 30  ;;  %v109_v14 = vsub.s32 4, %v85_v57 }
  0x38   :  { %v87_v59 = vsub.s32 %v83_v55, %v86_v58  ;;  %v110_v17 = vsel %vm25_vm7, %v109_v14, %v85_v57 }
  0x39   :  { %v112_v20 = vsel %vm24_vm8, 0, %v110_v17 }
  0x3a   :  { %v89_v60 = vsub.s32 0, %v87_v59  ;;  %v116_v21 = vadd.s32 3, %v112_v20 }
  0x3c   :  { %v144_v61 = vmin.u32 %v89_v60, %v87_v59  ;;  %v117_v22 = vand.u32 3, %v116_v21 }
  0x3e   :  { %v91_v62 = vclz %v144_v61  ;;  %vm122_vm9 = vcmp.eq.s32.totalorder %v117_v22, 2  ;;  %vm119_vm10 = vcmp.eq.s32.totalorder %v117_v22, 0  ;;  %vm118_vm11 = vcmp.lt.s32.totalorder %v117_v22, 2 }
  0x40   :  { %v145_v63 = vadd.s32 4294967294, %v91_v62 }
  0x42   :  { %vm146_vm6 = vcmp.lt.s32.totalorder %v145_v63, 0 }
  0x43   :  { %v94_v2 = vsel %vm146_vm6, 0, %v145_v63 }
  0x44   :  { %v95_v3 = vsub.s32 32, %v94_v2  ;;  %v96_v5 = vshll.u32 %v87_v59, %v94_v2  ;;  %v99_v6 = vsub.s32 4294967266, %v94_v2 }
  0x46   :  { %v97_v7 = vshrl.u32 %v79_v0, %v95_v3  ;;  %v100_v8 = vadd.s32 127, %v99_v6 }
  0x48   :  { %v98_v9 = vor.u32 %v97_v7, %v96_v5  ;;  %v101_v10 = vshll.u32 %v100_v8, 23 }
  0x4a   :  { %v102_v11 = vor.u32 4788187, %v101_v10  ;;  %v105_v12 = vcvt.s32.f32 %v98_v9 }
  0x4c   :  { %v103_v13 = vand.u32 2147483647, %v102_v11 }
  0x4e   :  { %v106_v15 = vmul.f32 %v105_v12, %v103_v13 }
  0x50   :  { %v107_v16 = vxor.u32 2147483648, %v106_v15 }
  0x52   :  { %v108_v18 = vsel %vm25_vm7, %v107_v16, %v106_v15 }
  0x53   :  { %v111_v19 = vsel %vm24_vm8, %v241_v1, %v108_v18 }
  0x54   :  { %159 = vcosq.f32 %v111_v19 }
  0x55   :  { %161 = vsinq.f32 %v111_v19 }
  0x5e   :  { %v160_v23 = vpop.eup %159 }
  0x5f   :  { %v162_v24 = vpop.eup %161  ;;  %v123_v25 = vxor.u32 2147483648, %v160_v23 }
  0x60   :  { %v120_v26 = vxor.u32 2147483648, %v162_v24 }
  0x61   :  { %v124_v4 = vsel %vm122_vm9, %v123_v25, %v162_v24 }
  0x62   :  { %v121_v27 = vsel %vm119_vm10, %v160_v23, %v120_v26 }
  0x63   :  { %v125_v28 = vsel %vm118_vm11, %v121_v27, %v124_v4 }
  0x64   :  { %v126_v29 = vsel %vm115_vm12, nan, %v125_v28 }
  0x65   :  { %127 = vst [vmem:[#allocation5] sm:$0xf] %v126_v29 }
  0x66   :  { %196 = shalt.err (!%p193_p12)
}
  0x67   :  { %s197_s22 = scalar_lea.hbm %s275_s1, 64 }
  0x68   :  { %p198_p13 = scmp.ne.s32.totalorder %s275_s1, %s197_s22  ;;  %p201_p0 = scmp.lt.u32.totalorder %s197_s22, %s275_s1 }
  0x6a   :  { %p203_p1 = pnand %p201_p0, %p198_p13 }
  0x6c   :  { %206 = shalt.err (!%p203_p1)
}
  0x6d   :  { %137 = dma.vmem_to_hbm [thread:$0]  %s135_s18, 64, %s275_s1, [#allocation4]  }
  0x6e   :  { %209 = dma.done.wait [#allocation4], 64  }
  0x6f   :  { %210 = vsyncadd [#allocation4], 4294967232 }
  0x70   :  { %141 = vsyncpa [#allocation3], 1 }
  0x71   :  { %142 = vsyncpa [#allocation4], 1 }

</bundles_post_ra>
